<compile_context>
chip_gen: v7x
topology: tpu7x:2x2x1
jax: 0.10.0
libtpu: 0.0.40
codegen_flags: <defaults>
</compile_context>

<pallas_src>
import functools
import math

import jax
import jax.numpy as jnp
from jax.experimental import pallas as pl
from jax.experimental.pallas import tpu as pltpu

_LANE = 128


def _cdiv(a, b):
    return -(-a // b)


def _round_up(n, m):
    return _cdiv(n, m) * m


def _vmem_capacity_bytes():
    try:
        info = pltpu.get_tpu_info()
        cap = int(getattr(info, "vmem_capacity_bytes", 0))
        if cap > 0:
            return cap
    except Exception:
        pass
    return 64 * 1024 * 1024  # conservative fallback (v7x per-TensorCore VMEM)


def _vmem_limit_bytes():
    # Above the 32 MiB scoped default but with headroom: ~96 MiB on v5e/v6e,
    # ~48 MiB on v7x.
    return int(min(_vmem_capacity_bytes() * 3 // 4, 100 * 1024 * 1024))


def _choose_row_tile(rows, p_eff, b, d, w_itemsize, x_itemsize, out_itemsize):
    """Output-row (class) tile: lane-aligned, VMEM-budgeted, padding bounded to
    <128 rows by balancing tiles, and >=2 grid steps whenever tiles can stay
    >=512 wide (so v7x's two TensorCores both get work)."""
    rows_128 = _round_up(rows, _LANE)

    budget = _vmem_capacity_bytes() // 2                    # keep half as headroom
    fixed = b * d * max(x_itemsize, 4) + b * 4              # resident x + inv_x
    avail = max(budget - fixed, 1 << 20)

    # Everything that scales with tile_r (bytes per output-row column):
    #   weight tile (double-buffered) + its f32 cast,
    #   output block (double-buffered),
    #   f32 dot/cos slabs (p_eff) + ~4 online-reduce temporaries.
    per_col = (p_eff * d * (2 * w_itemsize + 4)
               + 2 * b * out_itemsize
               + b * 4 * (p_eff + 4))
    max_tile = max(_LANE, (avail // per_col) // _LANE * _LANE)

    n_tiles = max(1, _cdiv(rows_128, max_tile))
    if n_tiles == 1 and rows_128 >= 2 * 512:
        n_tiles = 2                                         # megacore: feed both TCs
    tile_r = _round_up(_cdiv(rows_128, n_tiles), _LANE)
    n_tiles = _cdiv(rows_128, tile_r)
    return tile_r, n_tiles


def _pack_weight(weight, rows, p_eff, tile_r, n_tiles):
    """Lay the weight out as (D, n_tiles * p_eff * tile_r): contraction dim D on the
    sublane axis (native MXU orientation) and 128-aligned per-proxy slabs along the
    lanes.  For a static layer weight this packing should be done once per layer
    (cached / under jit), outside the per-call hot path."""
    o, d = weight.shape
    rows_pad = tile_r * n_tiles
    w = weight.reshape(rows, p_eff, d)        # row index = class * p_eff + proxy
    if rows_pad != rows:
        # Zero rows -> zero dots -> finite zero outputs, sliced off in the wrapper.
        w = jnp.pad(w, ((0, rows_pad - rows), (0, 0), (0, 0)))
    w = w.reshape(n_tiles, tile_r, p_eff, d)
    w = jnp.transpose(w, (3, 0, 2, 1))        # (D, n_tiles, p_eff, tile_r)
    return w.reshape(d, n_tiles * p_eff * tile_r)


def _cosine_linear_kernel(x_ref, inv_x_ref, w_ref, sigma_ref, out_ref, *,
                          p_eff, tile_r, use_sigma):
    # rsqrt(max(sumsq, eps^2)) == 1 / max(||v||, eps) with F.normalize's eps=1e-12.
    eps2 = 1e-24

    x = x_ref[...]                               # (B, D), native dtype -> MXU
    inv_x = inv_x_ref[...]                       # (B, 1) f32, precomputed in wrapper

    wt = w_ref[...]                              # (D, p_eff*tile_r), native dtype
    wf = wt.astype(jnp.float32)
    # Column norms: reduction over the sublane axis lands lane-major, no relayout.
    inv_w = jax.lax.rsqrt(
        jnp.maximum(jnp.sum(wf * wf, axis=0, keepdims=True), eps2))   # (1, P*tile_r)

    # One native-orientation MXU matmul per grid step (f32 accumulation).
    dots = jnp.dot(x, wt, preferred_element_type=jnp.float32)         # (B, P*tile_r)
    cos = dots * inv_x * inv_w                                         # cosine sims

    if p_eff == 1:
        out = cos                                # sigma folded into inv_x by wrapper
    else:
        # Online (flash-style) softmax-weighted reduction over proxies: classes stay
        # on the lane axis, ~4 live (B, tile_r) f32 temporaries regardless of p_eff.
        m = cos[:, 0:tile_r]
        denom = jnp.ones_like(m)
        num = m
        for p in range(1, p_eff):
            s = cos[:, p * tile_r:(p + 1) * tile_r]     # static, 128-aligned slab
            m_new = jnp.maximum(m, s)
            a = jnp.exp(m - m_new)
            e = jnp.exp(s - m_new)
            denom = a * denom + e
            num = a * num + e * s
            m = m_new
        out = num / denom
        if use_sigma:
            out = out * sigma_ref[0]

    out_ref[...] = out.astype(out_ref.dtype)


def cosine_linear(x, weight, sigma=None, *, nb_proxy=1, to_reduce=False):
    """Pallas implementation of CosineLinear.forward. Returns {'logits': ...}."""
    b, d = x.shape
    o, d2 = weight.shape
    assert d == d2

    reduce_p = bool(to_reduce) and nb_proxy > 1
    if reduce_p:
        assert o % nb_proxy == 0, "Shape error"
        rows, p_eff = o // nb_proxy, nb_proxy          # rows = number of classes C
    else:
        rows, p_eff = o, 1

    use_sigma = sigma is not None
    out_dtype = jnp.promote_types(x.dtype, weight.dtype)

    # Hoisted x-normalization: computed once in the wrapper, not per weight tile.
    xf = x.astype(jnp.float32)
    inv_x = jax.lax.rsqrt(
        jnp.maximum(jnp.sum(xf * xf, axis=1, keepdims=True), 1e-24))   # (B, 1)
    if use_sigma and p_eff == 1:
        inv_x = inv_x * jnp.asarray(sigma, jnp.float32)  # fold sigma into row scale

    sigma_arr = (jnp.asarray(sigma, jnp.float32).reshape((1,))
                 if use_sigma else jnp.zeros((1,), jnp.float32))

    tile_r, n_tiles = _choose_row_tile(
        rows, p_eff, b, d,
        jnp.dtype(weight.dtype).itemsize,
        jnp.dtype(x.dtype).itemsize,
        jnp.dtype(out_dtype).itemsize)
    rows_pad = tile_r * n_tiles

    w_packed = _pack_weight(weight, rows, p_eff, tile_r, n_tiles)

    kernel = functools.partial(_cosine_linear_kernel,
                               p_eff=p_eff, tile_r=tile_r, use_sigma=use_sigma)

    # NOTE: if this ever becomes MXU-bound (large B) with f32 inputs on v5e/v6e,
    # cast the dot operands to bf16 (keep f32 accumulation and f32 norm math).
    logits_pad = pl.pallas_call(
        kernel,
        out_shape=jax.ShapeDtypeStruct((b, rows_pad), out_dtype),
        grid=(n_tiles,),
        in_specs=[
            # Grid-invariant inputs: whole-array VMEM residency, no double buffer.
            pl.BlockSpec(memory_space=pltpu.MemorySpace.VMEM),   # x
            pl.BlockSpec(memory_space=pltpu.MemorySpace.VMEM),   # inv_x (B,1) f32
            # Weight streamed in (D, p_eff*tile_r) tiles (default double-buffered;
            # bump to pipeline_mode=pl.Buffered(3) only if a trace shows exposed DMA).
            pl.BlockSpec((d, p_eff * tile_r), lambda i: (0, i)),
            pl.BlockSpec(memory_space=pltpu.MemorySpace.SMEM),   # sigma scalar
        ],
        out_specs=pl.BlockSpec((b, tile_r), lambda i: (0, i)),   # lane-dense output
        compiler_params=pltpu.CompilerParams(
            dimension_semantics=("parallel",),
            vmem_limit_bytes=_vmem_limit_bytes(),
        ),
    )(x, inv_x, w_packed, sigma_arr)

    logits = logits_pad[:, :rows] if rows_pad != rows else logits_pad
    return {"logits": logits}


def _reference(x, weight, sigma, nb_proxy, to_reduce):
    eps = 1e-12
    xn = x / jnp.maximum(jnp.linalg.norm(x, axis=1, keepdims=True), eps)
    wn = weight / jnp.maximum(jnp.linalg.norm(weight, axis=1, keepdims=True), eps)
    out = xn @ wn.T
    if to_reduce and nb_proxy > 1:
        b, o = out.shape
        c = o // nb_proxy
        simi = out.reshape(b, c, nb_proxy)
        att = jax.nn.softmax(simi, axis=-1)
        out = (att * simi).sum(-1)
    if sigma is not None:
        out = sigma * out
    return out


if __name__ == "__main__":
    # Module config (small, consistent with CosineLinear.__init__).
    in_features = 32
    out_features = 16
    nb_proxy = 2
    to_reduce = True
    batch = 8

    key = jax.random.PRNGKey(0)
    kx, kw = jax.random.split(key)

    # Deterministic parameter init mirroring reset_parameters():
    #   weight ~ U(-stdv, stdv), stdv = 1/sqrt(in_features); sigma = 1.0
    stdv = 1.0 / math.sqrt(in_features)
    weight = jax.random.uniform(
        kw, (out_features * nb_proxy, in_features),
        minval=-stdv, maxval=stdv, dtype=jnp.float32)
    sigma = jnp.float32(1.0)

    x = jax.random.normal(kx, (batch, in_features), dtype=jnp.float32)

    # Path 1: proxy softmax-reduction + sigma.
    result = cosine_linear(x, weight, sigma, nb_proxy=nb_proxy, to_reduce=to_reduce)
    logits = jax.block_until_ready(result["logits"])
    ref = _reference(x, weight, sigma, nb_proxy, to_reduce)
    assert logits.shape == ref.shape, (logits.shape, ref.shape)
    assert jnp.allclose(logits, ref, atol=1e-5, rtol=1e-5), "mismatch vs reference (reduce)"

    # Path 2: plain cosine linear (nb_proxy=1, no sigma).
    result2 = cosine_linear(x, weight, None, nb_proxy=1, to_reduce=False)
    logits2 = jax.block_until_ready(result2["logits"])
    ref2 = _reference(x, weight, None, 1, False)
    assert logits2.shape == ref2.shape, (logits2.shape, ref2.shape)
    assert jnp.allclose(logits2, ref2, atol=1e-5, rtol=1e-5), "mismatch vs reference (plain)"

    print("KERNEL_OK")
</pallas_src>

<mosaic_0001>
module attributes {stable_mosaic.version = 11 : i64} {
  func.func @_cosine_linear_kernel(%arg0: i32, %arg1: memref<8x32xf32, #tpu.memory_space<vmem>>, %arg2: memref<8x1xf32, #tpu.memory_space<vmem>>, %arg3: memref<32x256xf32, #tpu.memory_space<vmem>>, %arg4: memref<1xf32, #tpu.memory_space<smem>>, %arg5: memref<8x128xf32, #tpu.memory_space<vmem>>) attributes {dimension_semantics = [#tpu.dimension_semantics<parallel>], iteration_bounds = array<i64: 1>, scalar_prefetch = 0 : i64, scratch_operands = 0 : i64, tpu.core_type = #tpu.core_type<tc>, window_params = [{pipeline_mode = #tpu.pipeline_mode<synchronous>, transform_indices = @transform_0, window_bounds = array<i64: 8, 32>}, {pipeline_mode = #tpu.pipeline_mode<synchronous>, transform_indices = @transform_1, window_bounds = array<i64: 8, 1>}, {transform_indices = @transform_2, window_bounds = array<i64: 32, 256>}, {transform_indices = @transform_3, window_bounds = array<i64: 1>}, {transform_indices = @transform_4, window_bounds = array<i64: 8, 128>}]} {
    %c0 = arith.constant 0 : index
    %c0_0 = arith.constant 0 : index
    %0 = vector.load %arg1[%c0, %c0_0] : memref<8x32xf32, #tpu.memory_space<vmem>>, vector<8x32xf32>
    %c0_1 = arith.constant 0 : index
    %c0_2 = arith.constant 0 : index
    %1 = vector.load %arg2[%c0_1, %c0_2] : memref<8x1xf32, #tpu.memory_space<vmem>>, vector<8x1xf32>
    %c0_3 = arith.constant 0 : index
    %c0_4 = arith.constant 0 : index
    %2 = vector.load %arg3[%c0_3, %c0_4] : memref<32x256xf32, #tpu.memory_space<vmem>>, vector<32x256xf32>
    %3 = arith.mulf %2, %2 : vector<32x256xf32>
    %cst = arith.constant dense<0.000000e+00> : vector<256xf32>
    %4 = vector.multi_reduction <add>, %3, %cst [0] : vector<32x256xf32> to vector<256xf32>
    %5 = vector.shape_cast %4 : vector<256xf32> to vector<1x256xf32>
    %cst_5 = arith.constant 1.000000e-24 : f32
    %6 = vector.broadcast %cst_5 : f32 to vector<1x256xf32>
    %7 = arith.maximumf %5, %6 : vector<1x256xf32>
    %8 = math.rsqrt %7 : vector<1x256xf32>
    %cst_6 = arith.constant dense<0.000000e+00> : vector<8x256xf32>
    %9 = tpu.matmul %0, %2, %cst_6 {dimension_numbers = #tpu.dot_dimension_numbers<[1], [0], [0], [1], [0, 0, 1, 1], [], []>} : vector<8x32xf32>, vector<32x256xf32>, vector<8x256xf32> -> vector<8x256xf32>
    %10 = vector.broadcast %1 : vector<8x1xf32> to vector<8x256xf32>
    %11 = arith.mulf %9, %10 : vector<8x256xf32>
    %12 = vector.broadcast %8 : vector<1x256xf32> to vector<8x256xf32>
    %13 = arith.mulf %11, %12 : vector<8x256xf32>
    %14 = vector.extract_strided_slice %13 {offsets = [0, 0], sizes = [8, 128], strides = [1, 1]} : vector<8x256xf32> to vector<8x128xf32>
    %cst_7 = arith.constant 1.000000e+00 : f32
    %15 = vector.broadcast %cst_7 : f32 to vector<8x128xf32>
    %16 = vector.extract_strided_slice %13 {offsets = [0, 128], sizes = [8, 128], strides = [1, 1]} : vector<8x256xf32> to vector<8x128xf32>
    %17 = arith.maximumf %14, %16 : vector<8x128xf32>
    %18 = arith.subf %14, %17 : vector<8x128xf32>
    %19 = math.exp %18 : vector<8x128xf32>
    %20 = arith.subf %16, %17 : vector<8x128xf32>
    %21 = math.exp %20 : vector<8x128xf32>
    %22 = arith.mulf %19, %15 : vector<8x128xf32>
    %23 = arith.addf %22, %21 : vector<8x128xf32>
    %24 = arith.mulf %19, %14 : vector<8x128xf32>
    %25 = arith.mulf %21, %16 : vector<8x128xf32>
    %26 = arith.addf %24, %25 : vector<8x128xf32>
    %27 = arith.divf %26, %23 : vector<8x128xf32>
    %c0_8 = arith.constant 0 : index
    %28 = memref.load %arg4[%c0_8] : memref<1xf32, #tpu.memory_space<smem>>
    %29 = vector.broadcast %28 : f32 to vector<8x128xf32>
    %30 = arith.mulf %27, %29 : vector<8x128xf32>
    %c0_9 = arith.constant 0 : index
    %c0_10 = arith.constant 0 : index
    %31 = vector.load %arg5[%c0_9, %c0_10] : memref<8x128xf32, #tpu.memory_space<vmem>>, vector<8x128xf32>
    tpu.vector_store %arg5[%c0_9, %c0_10], %30 {strides = array<i32>} : memref<8x128xf32, #tpu.memory_space<vmem>>, vector<8x128xf32>,
    return
  }
  func.func @transform_0(%arg0: i32) -> (i32, i32) {
    %c0_i32 = arith.constant 0 : i32
    %c0_i32_0 = arith.constant 0 : i32
    %c0_i32_1 = arith.constant 0 : i32
    return %c0_i32, %c0_i32_0 : i32, i32
  }
  func.func @transform_1(%arg0: i32) -> (i32, i32) {
    %c0_i32 = arith.constant 0 : i32
    %c0_i32_0 = arith.constant 0 : i32
    %c0_i32_1 = arith.constant 0 : i32
    return %c0_i32, %c0_i32_0 : i32, i32
  }
  func.func @transform_2(%arg0: i32) -> (i32, i32) {
    %c0_i32 = arith.constant 0 : i32
    %c0_i32_0 = arith.constant 0 : i32
    return %c0_i32, %arg0 : i32, i32
  }
  func.func @transform_3(%arg0: i32) -> i32 {
    %c0_i32 = arith.constant 0 : i32
    %c0_i32_0 = arith.constant 0 : i32
    return %c0_i32 : i32
  }
  func.func @transform_4(%arg0: i32) -> (i32, i32) {
    %c0_i32 = arith.constant 0 : i32
    %c0_i32_0 = arith.constant 0 : i32
    return %c0_i32, %arg0 : i32, i32
  }
}

</mosaic_0001>

<bundles_post_ra>
// kernel: tpu_custom_call.1
= control target key start
LH: loop header
LB: loop body
LE: loop exit
PB: predicated region body
PF: predicated region fallthrough
CT: control target
= control target key end

     0   :  { %10 = vsyncpa [#allocation4], 0  ;;  %s327_s0 = inlined_call_operand.vmem [shape: f32[8,32], index: 0, kind: input, shape index: {}]   ;;  %s328_s1 = inlined_call_operand.vmem [shape: f32[8,1], index: 1, kind: input, shape index: {}]   ;;  %s329_s2 = inlined_call_operand.hbm [shape: f32[32,256], index: 2, kind: input, shape index: {}]   ;;  %s330_s3 = inlined_call_operand.<no memory space> [shape: f32[1], index: 3, kind: input, shape index: {}]   ;;  %s331_s4 = inlined_call_operand.hbm [shape: f32[8,128], index: 4, kind: output, shape index: {}]  }
   0x1   :  { %11 = vsyncpa [#allocation5], 0  ;;  %s263_s15 = smov [#allocation3]   ;;  %s215_s19 = scalar_lea.hbm %s329_s2, 1024 }
   0x2   :  { %s21_s16 = sshll.u32 %s263_s15, 4  ;;  %p216_p0 = scmp.ne.s32.totalorder %s329_s2, %s215_s19  ;;  %s22_s16 = int_to_ptr.vmem [resolvable:$true] %s21_s16 }
   0x3   :  { %p219_p1 = scmp.lt.u32.totalorder %s215_s19, %s329_s2 }
   0x5   :  { %p221_p2 = pnand %p219_p1, %p216_p0 }
   0x7   :  { %224 = shalt.err (!%p221_p2)
}
   0x8   :  { %s225_s24 = scalar_lea.vmem %s22_s16, 1024  ;;  %p230_p4 = scmp.lt.s32.totalorder %s22_s16, %s22_s16 }
   0x9   :  { %p226_p3 = scmp.ne.s32.totalorder %s22_s16, %s225_s24  ;;  %p231_p5 = scmp.lt.s32.totalorder %s225_s24, %s225_s24 }
   0xb   :  { %p232_p6 = por %p231_p5, %p230_p4 }
   0xd   :  { %p233_p7 = pnand %p232_p6, %p226_p3 }
   0xf   :  { %236 = shalt.err (!%p233_p7)
}
  0x10   :  { %s264_s25 = smov 256   ;;  %s265_s26 = smov 16  }
  0x11   :  { %27 = dma.hbm_to_vmem [thread:$0]  %s329_s2, 1024, %s22_s16, [#allocation4], %s264_s25, %s264_s25, %s265_s26  }
  0x12   :  { %259 = dma.done.wait [#allocation4], 1024  }
  0x13   :  { %260 = vsyncadd [#allocation4], 4294966272  ;;  %v266_v0 = vmov 0.0   ;;  %v267_v1 = vmov 0   ;;  %v36_v2 = vld [vmem:[#allocation3 + $0x8] sm:$0xff]  ;;  %v38_v3 = vld [vmem:[#allocation3 + $0x18] sm:$0xff] }
  0x14   :  { %141 = vmatprep.mubr.f32.mxu0 %v266_v0  ;;  %204 = vset.pattern.permute.xlu0 %v267_v1  ;;  %v35_v4 = vld [vmem:[#allocation3] sm:$0xff]  ;;  %v44_v5 = vmul.f32 %v36_v2, %v36_v2  ;;  %v46_v6 = vmul.f32 %v38_v3, %v38_v3  ;;  %v190_v7 = vpack.c.bf16 %v38_v3, %v36_v2  ;;  %v37_v8 = vld [vmem:[#allocation3 + $0x10] sm:$0xff]  ;;  %v40_v10 = vld [vmem:[#allocation3 + $0x28] sm:$0xff]  ;;  %vm73_vm0 = vcmask 261120   ;;  %s268_s6 = smov [#allocation6]  }
  0x15   :  { %v43_v9 = vmul.f32 %v35_v4, %v35_v4  ;;  %v42_v11 = vld [vmem:[#allocation3 + $0x38] sm:$0xff]  ;;  %v45_v12 = vmul.f32 %v37_v8, %v37_v8  ;;  %v192_v13 = vpack.c.bf16 %v37_v8, %v35_v4  ;;  %v48_v14 = vmul.f32 %v40_v10, %v40_v10  ;;  %v39_v15 = vld [vmem:[#allocation3 + $0x20] sm:$0xff]  ;;  %v41_v16 = vld [vmem:[#allocation3 + $0x30] sm:$0xff]  ;;  %s180_s7 = sshll.u32 %s268_s6, 4  ;;  %s181_s7 = int_to_ptr.vmem [resolvable:$true] %s180_s7 }
  0x16   :  { %v60_v17 = vadd.f32 %v46_v6, %v44_v5  ;;  %191 = vmatprep.subr.bf16.mxu0 %v190_v7  ;;  %v50_v18 = vmul.f32 %v42_v11, %v42_v11  ;;  %v194_v19 = vpack.c.bf16 %v42_v11, %v40_v10  ;;  %v47_v20 = vmul.f32 %v39_v15, %v39_v15  ;;  %v34_v21 = vld [vmem:[%s328_s1] sm:$0xff]  ;;  %s237_s8 = scalar_lea.vmem %s181_s7, 128  ;;  %p242_p9 = scmp.lt.s32.totalorder %s181_s7, %s181_s7 }
  0x17   :  { %v51_v22 = vadd.f32 %v45_v12, %v43_v9  ;;  %193 = vmatpush1.bf16.msra.mxu0 %v192_v13  ;;  %v49_v23 = vmul.f32 %v41_v16, %v41_v16  ;;  %v196_v24 = vpack.c.bf16 %v41_v16, %v39_v15  ;;  %150 = vperm.xlu0 %204, %v34_v21   ;;  %v33_v29 = vld [vmem:[%s327_s0] sm:$0xff]  ;;  %v171_v1 = vstv %s330_s3  ;;  %p238_p8 = scmp.ne.s32.totalorder %s181_s7, %s237_s8  ;;  %p243_p10 = scmp.lt.s32.totalorder %s237_s8, %s237_s8 }
  0x18   :  { %v61_v25 = vadd.f32 %v60_v17, %v48_v14  ;;  %195 = vmatprep.subr.bf16.mxu0 %v194_v19 }
  0x19   :  { %v52_v26 = vadd.f32 %v51_v22, %v47_v20  ;;  %p244_p11 = por %p243_p10, %p242_p9 }
  0x1a   :  { %v62_v27 = vadd.f32 %v61_v25, %v50_v18 }
  0x1b   :  { %v53_v28 = vadd.f32 %v52_v26, %v49_v23  ;;  %197 = vmatpush1.bf16.msra.mxu0 %v196_v24  ;;  %p245_p12 = pnand %p244_p11, %p238_p8 }
  0x1c   :  { %v63_v31 = vrot.slane %v62_v27, 4 }
  0x1d   :  { %v54_v30 = vrot.slane %v53_v28, 4 }
  0x1e   :  { %189 = vmatmul.mubr.msk.f32.vlgmr.msra.gmra.mrb[0].mxu0 %vm73_vm0, %v33_v29  ;;  %v64_v33 = vadd.f32 %v63_v31, %v62_v27 }
  0x1f   :  { %v55_v32 = vadd.f32 %v54_v30, %v53_v28 }
  0x20   :  { %v65_v35 = vrot.slane %v64_v33, 2 }
  0x21   :  { %v56_v34 = vrot.slane %v55_v32, 2 }
  0x22   :  { %v66_v37 = vadd.f32 %v65_v35, %v64_v33 }
  0x23   :  { %v57_v36 = vadd.f32 %v56_v34, %v55_v32 }
  0x24   :  { %v67_v39 = vrot.slane %v66_v37, 1 }
  0x25   :  { %v58_v38 = vrot.slane %v57_v36, 1 }
  0x26   :  { %v68_v41 = vadd.f32 %v67_v39, %v66_v37 }
  0x27   :  { %v59_v40 = vadd.f32 %v58_v38, %v57_v36 }
  0x28   :  { %v70_v43 = vmax.f32 %v68_v41, 1e-24 }
  0x29   :  { %v69_v42 = vmax.f32 %v59_v40, 1e-24 }
  0x2b   :  { %205 = vrsqrt.f32 %v69_v42 }
  0x2c   :  { %207 = vrsqrt.f32 %v70_v43 }
  0x35   :  { %v206_v45 = vpop.eup %205 }
  0x36   :  { %v208_v47 = vpop.eup %207 }
  0x96   :  { %v151_v44 = vpop.permute.xlu0 %150 }
  0xf1   :  { %v143_v46 = vpop.f32.mrb[0].mxu0 }
  0xf2   :  { %v153_v48 = vmul.f32 %v151_v44, %v143_v46  ;;  %v145_v49 = vpop.f32.mrb[1].mxu0 }
  0xf3   :  { %v154_v50 = vmul.f32 %v151_v44, %v145_v49 }
  0xf4   :  { %v155_v51 = vmul.f32 %v206_v45, %v153_v48 }
  0xf5   :  { %v156_v52 = vmul.f32 %v208_v47, %v154_v50 }
  0xf7   :  { %v157_v53 = vmax.f32 %v155_v51, %v156_v52 }
  0xf9   :  { %v158_v54 = vsub.f32 %v155_v51, %v157_v53  ;;  %v161_v55 = vsub.f32 %v156_v52, %v157_v53 }
  0xfb   :  { %v159_v56 = vmul.f32 1.442695, %v158_v54  ;;  %v162_v57 = vmul.f32 1.442695, %v161_v55 }
  0xfd   :  { %209 = vpow2.f32 %v159_v56 }
  0xfe   :  { %211 = vpow2.f32 %v162_v57 }
 0x107   :  { %v210_v58 = vpop.eup %209 }
 0x108   :  { %v212_v59 = vpop.eup %211  ;;  %v165_v60 = vmul.f32 %v210_v58, %v155_v51 }
 0x109   :  { %v166_v61 = vmul.f32 %v212_v59, %v156_v52  ;;  %v164_v62 = vadd.f32 %v212_v59, %v210_v58 }
 0x10b   :  { %v167_v63 = vadd.f32 %v166_v61, %v165_v60  ;;  %213 = vrcp.f32 %v164_v62 }
 0x115   :  { %v214_v0 = vpop.eup %213 }
 0x116   :  { %v169_v2 = vmul.f32 %v214_v0, %v167_v63 }
 0x118   :  { %v172_v3 = vmul.f32 %v171_v1, %v169_v2 }
 0x11a   :  { %173 = vst [vmem:[#allocation6] sm:$0xff] %v172_v3 }
 0x11b   :  { %248 = shalt.err (!%p245_p12)
}
 0x11c   :  { %s249_s11 = scalar_lea.hbm %s331_s4, 128 }
 0x11d   :  { %p250_p13 = scmp.ne.s32.totalorder %s331_s4, %s249_s11  ;;  %p253_p0 = scmp.lt.u32.totalorder %s249_s11, %s331_s4 }
 0x11f   :  { %p255_p1 = pnand %p253_p0, %p250_p13 }
 0x121   :  { %258 = shalt.err (!%p255_p1)
}
 0x122   :  { %183 = dma.vmem_to_hbm [thread:$0]  %s181_s7, 128, %s331_s4, [#allocation5]  }
 0x123   :  { %261 = dma.done.wait [#allocation5], 128  }
 0x124   :  { %262 = vsyncadd [#allocation5], 4294967168 }
 0x125   :  { %187 = vsyncpa [#allocation4], 1 }
 0x126   :  { %188 = vsyncpa [#allocation5], 1 }

</bundles_post_ra>
